<compile_context>
chip_gen: v7x
topology: tpu7x:2x2x1
jax: 0.10.0
libtpu: 0.0.40
codegen_flags: <defaults>
</compile_context>

<pallas_src>
import jax
import jax.numpy as jnp
from jax.experimental import pallas as pl
from jax.experimental.pallas import tpu as pltpu

SCALE = 2.0343017578125e-05     # constant from the reference module
DROP_P = 0.3                    # dropout probability from the reference module


def _sdpa_kernel(q_ref, x_ref, m_ref, o_ref):
    """One group of G heads per grid step.

    q_ref : (G, S, D)  "query" tensor (== mul_3 in the reference module)
    x_ref : (G, S, N)  forward input x1
    m_ref : (G, S, S)  precomputed dropout mask, values in {0, 1/(1-p)}
    o_ref : (G, S, N)  output = dropout(softmax(q q^T * scale)) @ x
    """
    q = q_ref[...].astype(jnp.float32)            # (G, S, D)
    x = x_ref[...].astype(jnp.float32)            # (G, S, N)
    drop = m_ref[...]                             # (G, S, S), already / (1-p)

    # scores = (Q * scale) @ Q^T  — scale folded into the (S, D) operand,
    # contraction on the last dims (no explicit transpose materialized).
    s = jnp.einsum('gqd,gkd->gqk', q * SCALE, q,
                   preferred_element_type=jnp.float32)        # (G, S, S)

    # numerically stable softmax numerator + row sums
    m = jnp.max(s, axis=-1, keepdims=True)
    e = jnp.exp(s - m)
    denom = jnp.sum(e, axis=-1, keepdims=True)                # (G, S, 1)

    # apply the (pre-scaled) dropout mask to the unnormalized probabilities
    p = e * drop                                              # (G, S, S)

    # second matmul first, then defer the per-row normalization to S*N work
    o = jnp.einsum('gqk,gkn->gqn', p, x,
                   preferred_element_type=jnp.float32)        # (G, S, N)
    o_ref[...] = (o * (1.0 / denom)).astype(o_ref.dtype)


def _pick_head_group(bh, s, d, n, budget_bytes=8 << 20):
    """Largest divisor of BH whose per-step f32 footprint fits a VMEM budget."""
    per_head = 4 * (s * d + 2 * s * n + 2 * s * s)   # q, x, out, mask, scores
    g = max(1, min(bh, budget_bytes // max(per_head, 1)))
    while bh % g:
        g -= 1
    return g


def sdpa_forward(q, x, drop_mask):
    """q: (B, H, S, D), x: (B, H, S, N), drop_mask: (B, H, S, S) -> (B, H, S, N)."""
    B, H, S, D = q.shape
    N = x.shape[-1]
    BH = B * H
    qf = q.reshape(BH, S, D)
    xf = x.reshape(BH, S, N)
    mf = drop_mask.reshape(BH, S, S).astype(jnp.float32)

    G = _pick_head_group(BH, S, D, N)        # heads per grid step

    out = pl.pallas_call(
        _sdpa_kernel,
        out_shape=jax.ShapeDtypeStruct((BH, S, N), x.dtype),
        grid=(BH // G,),
        in_specs=[
            pl.BlockSpec((G, S, D), lambda i: (i, 0, 0)),
            pl.BlockSpec((G, S, N), lambda i: (i, 0, 0)),
            pl.BlockSpec((G, S, S), lambda i: (i, 0, 0)),
        ],
        out_specs=pl.BlockSpec((G, S, N), lambda i: (i, 0, 0)),
        compiler_params=pltpu.CompilerParams(
            dimension_semantics=("parallel",)),   # independent head groups
    )(qf, xf, mf)

    return out.reshape(B, H, S, N)


class PallasModel:
    """JAX/Pallas analogue of the reference PyTorch `Model`.

    The reference module's `__init__` constructs a tensor (`mul_3`) through a
    chain of (broken) fuse_modules calls; here it is replaced by a fixed
    random parameter of the same shape as x1, and the dropout mask is sampled
    once at init (matching the reference, where dropout is baked into the
    precomputed attention matrix).
    # TODO(synk): the fuse_modules / bn / conv plumbing in __init__ has no
    # well-defined semantics and is not reproduced; only the SDPA math is.
    """

    def __init__(self, shape=(1, 2, 4, 4), seed=0):
        B, H, S, D = shape
        kq, kd = jax.random.split(jax.random.PRNGKey(seed))
        self.q = jax.random.normal(kq, shape, dtype=jnp.float32)  # == mul_3
        keep = jax.random.bernoulli(kd, p=1.0 - DROP_P, shape=(B, H, S, S))
        # store the mask pre-scaled by 1/(1-p): kernel just multiplies
        self.drop_mask = keep.astype(jnp.float32) / (1.0 - DROP_P)

    def __call__(self, x1):
        return sdpa_forward(self.q, x1, self.drop_mask)


if __name__ == "__main__":
    # shapes consistent with the reference module: x1 = torch.randn(1, 2, 4, 4)
    key = jax.random.PRNGKey(0)
    x1 = jax.random.normal(key, (1, 2, 4, 4), dtype=jnp.float32)

    model = PallasModel(shape=(1, 2, 4, 4), seed=0)
    out = jax.block_until_ready(model(x1))

    assert out.shape == (1, 2, 4, 4)
    assert out.dtype == jnp.float32
    print("KERNEL_OK")
</pallas_src>

<mosaic_0001>
module attributes {stable_mosaic.version = 11 : i64} {
  func.func @_sdpa_kernel(%arg0: i32, %arg1: memref<2x4x4xf32, #tpu.memory_space<vmem>>, %arg2: memref<2x4x4xf32, #tpu.memory_space<vmem>>, %arg3: memref<2x4x4xf32, #tpu.memory_space<vmem>>, %arg4: memref<2x4x4xf32, #tpu.memory_space<vmem>>) attributes {dimension_semantics = [#tpu.dimension_semantics<parallel>], iteration_bounds = array<i64: 1>, scalar_prefetch = 0 : i64, scratch_operands = 0 : i64, tpu.core_type = #tpu.core_type<tc>, window_params = [{transform_indices = @transform_0, window_bounds = array<i64: 2, 4, 4>}, {transform_indices = @transform_1, window_bounds = array<i64: 2, 4, 4>}, {transform_indices = @transform_2, window_bounds = array<i64: 2, 4, 4>}, {transform_indices = @transform_3, window_bounds = array<i64: 2, 4, 4>}]} {
    %c0 = arith.constant 0 : index
    %c0_0 = arith.constant 0 : index
    %c0_1 = arith.constant 0 : index
    %0 = vector.load %arg1[%c0, %c0_0, %c0_1] : memref<2x4x4xf32, #tpu.memory_space<vmem>>, vector<2x4x4xf32>
    %c0_2 = arith.constant 0 : index
    %c0_3 = arith.constant 0 : index
    %c0_4 = arith.constant 0 : index
    %1 = vector.load %arg2[%c0_2, %c0_3, %c0_4] : memref<2x4x4xf32, #tpu.memory_space<vmem>>, vector<2x4x4xf32>
    %c0_5 = arith.constant 0 : index
    %c0_6 = arith.constant 0 : index
    %c0_7 = arith.constant 0 : index
    %2 = vector.load %arg3[%c0_5, %c0_6, %c0_7] : memref<2x4x4xf32, #tpu.memory_space<vmem>>, vector<2x4x4xf32>
    %cst = arith.constant 2.03430172E-5 : f32
    %3 = vector.broadcast %cst : f32 to vector<2x4x4xf32>
    %4 = arith.mulf %0, %3 : vector<2x4x4xf32>
    "tpu.trace_start"() <{level = 10 : i32, message = "gqd,gkd->gqk"}> : () -> ()
    %cst_8 = arith.constant dense<0.000000e+00> : vector<2x4x4xf32>
    %5 = tpu.matmul %4, %0, %cst_8 {dimension_numbers = #tpu.dot_dimension_numbers<[2], [2], [1], [1], [0, 0, 0, 1, 1, 1], [0], [0]>} : vector<2x4x4xf32>, vector<2x4x4xf32>, vector<2x4x4xf32> -> vector<2x4x4xf32>
    "tpu.trace_stop"() : () -> ()
    %cst_9 = arith.constant dense<0xFF800000> : vector<2x4xf32>
    %6 = vector.multi_reduction <maximumf>, %5, %cst_9 [2] : vector<2x4x4xf32> to vector<2x4xf32>
    %7 = vector.shape_cast %6 : vector<2x4xf32> to vector<2x4x1xf32>
    %8 = vector.broadcast %7 : vector<2x4x1xf32> to vector<2x4x4xf32>
    %9 = arith.subf %5, %8 : vector<2x4x4xf32>
    %10 = math.exp %9 : vector<2x4x4xf32>
    %cst_10 = arith.constant dense<0.000000e+00> : vector<2x4xf32>
    %11 = vector.multi_reduction <add>, %10, %cst_10 [2] : vector<2x4x4xf32> to vector<2x4xf32>
    %12 = vector.shape_cast %11 : vector<2x4xf32> to vector<2x4x1xf32>
    %13 = arith.mulf %10, %2 : vector<2x4x4xf32>
    "tpu.trace_start"() <{level = 10 : i32, message = "gqk,gkn->gqn"}> : () -> ()
    %cst_11 = arith.constant dense<0.000000e+00> : vector<2x4x4xf32>
    %14 = tpu.matmul %13, %1, %cst_11 {dimension_numbers = #tpu.dot_dimension_numbers<[2], [1], [1], [2], [0, 0, 0, 1, 1, 2], [0], [0]>} : vector<2x4x4xf32>, vector<2x4x4xf32>, vector<2x4x4xf32> -> vector<2x4x4xf32>
    "tpu.trace_stop"() : () -> ()
    %cst_12 = arith.constant 1.000000e+00 : f32
    %15 = vector.broadcast %cst_12 : f32 to vector<2x4x1xf32>
    %16 = arith.divf %15, %12 : vector<2x4x1xf32>
    %17 = vector.broadcast %16 : vector<2x4x1xf32> to vector<2x4x4xf32>
    %18 = arith.mulf %14, %17 : vector<2x4x4xf32>
    %c0_13 = arith.constant 0 : index
    %c0_14 = arith.constant 0 : index
    %c0_15 = arith.constant 0 : index
    %19 = vector.load %arg4[%c0_13, %c0_14, %c0_15] : memref<2x4x4xf32, #tpu.memory_space<vmem>>, vector<2x4x4xf32>
    tpu.vector_store %arg4[%c0_13, %c0_14, %c0_15], %18 {strides = array<i32>} : memref<2x4x4xf32, #tpu.memory_space<vmem>>, vector<2x4x4xf32>,
    return
  }
  func.func @transform_0(%arg0: i32) -> (i32, i32, i32) {
    %c0_i32 = arith.constant 0 : i32
    %c0_i32_0 = arith.constant 0 : i32
    %c0_i32_1 = arith.constant 0 : i32
    return %arg0, %c0_i32, %c0_i32_0 : i32, i32, i32
  }
  func.func @transform_1(%arg0: i32) -> (i32, i32, i32) {
    %c0_i32 = arith.constant 0 : i32
    %c0_i32_0 = arith.constant 0 : i32
    %c0_i32_1 = arith.constant 0 : i32
    return %arg0, %c0_i32, %c0_i32_0 : i32, i32, i32
  }
  func.func @transform_2(%arg0: i32) -> (i32, i32, i32) {
    %c0_i32 = arith.constant 0 : i32
    %c0_i32_0 = arith.constant 0 : i32
    %c0_i32_1 = arith.constant 0 : i32
    return %arg0, %c0_i32, %c0_i32_0 : i32, i32, i32
  }
  func.func @transform_3(%arg0: i32) -> (i32, i32, i32) {
    %c0_i32 = arith.constant 0 : i32
    %c0_i32_0 = arith.constant 0 : i32
    %c0_i32_1 = arith.constant 0 : i32
    return %arg0, %c0_i32, %c0_i32_0 : i32, i32, i32
  }
}

</mosaic_0001>

<bundles_post_ra>
// kernel: tpu_custom_call.1
= control target key start
LH: loop header
LB: loop body
LE: loop exit
PB: predicated region body
PF: predicated region fallthrough
CT: control target
= control target key end

     0   :  { %8 = vsyncpa [#allocation3], 0  ;;  %s674_s0 = inlined_call_operand.hbm [shape: f32[2,4,4], index: 0, kind: input, shape index: {}]   ;;  %s675_s1 = inlined_call_operand.hbm [shape: f32[2,4,4], index: 1, kind: input, shape index: {}]   ;;  %s676_s2 = inlined_call_operand.hbm [shape: f32[2,4,4], index: 2, kind: input, shape index: {}]   ;;  %s677_s3 = inlined_call_operand.hbm [shape: f32[2,4,4], index: 3, kind: output, shape index: {}]  }
   0x1   :  { %9 = vsyncpa [#allocation6], 0 }
   0x2   :  { %10 = vsyncpa [#allocation4], 0  ;;  %s563_s12 = smov [#allocation5]   ;;  %s564_s14 = smov [#allocation2]  }
   0x3   :  { %s28_s13 = sshll.u32 %s563_s12, 4  ;;  %s16_s15 = sshll.u32 %s564_s14, 4  ;;  %s29_s13 = int_to_ptr.vmem [resolvable:$true] %s28_s13  ;;  %s591_s15 = int_to_ptr.vmem [resolvable:$true] %s16_s15 }
   0x4   :  { %s469_s18 = scalar_lea.hbm %s675_s1, 128 }
   0x5   :  { %p470_p0 = scmp.ne.s32.totalorder %s675_s1, %s469_s18  ;;  %p473_p1 = scmp.lt.u32.totalorder %s469_s18, %s675_s1 }
   0x7   :  { %p475_p2 = pnand %p473_p1, %p470_p0 }
   0x9   :  { %478 = shalt.err (!%p475_p2)
}
   0xa   :  { %s479_s23 = scalar_lea.vmem %s29_s13, 128  ;;  %p484_p4 = scmp.lt.s32.totalorder %s29_s13, %s29_s13 }
   0xb   :  { %p480_p3 = scmp.ne.s32.totalorder %s29_s13, %s479_s23  ;;  %p485_p5 = scmp.lt.s32.totalorder %s479_s23, %s479_s23 }
   0xd   :  { %p486_p6 = por %p485_p5, %p484_p4 }
   0xf   :  { %p487_p7 = pnand %p486_p6, %p480_p3 }
  0x11   :  { %490 = shalt.err (!%p487_p7)
}
  0x12   :  { %s565_s24 = smov 64   ;;  %s566_s25 = smov 4  }
  0x13   :  { %34 = dma.hbm_to_vmem [thread:$0]  %s675_s1, 128, %s29_s13, [#allocation6], %s565_s24, %s565_s24, %s566_s25  }
  0x14   :  { %s491_s30 = scalar_lea.hbm %s674_s0, 128 }
  0x15   :  { %p492_p8 = scmp.ne.s32.totalorder %s674_s0, %s491_s30  ;;  %p495_p9 = scmp.lt.u32.totalorder %s491_s30, %s674_s0 }
  0x17   :  { %p497_p10 = pnand %p495_p9, %p492_p8 }
  0x19   :  { %500 = shalt.err (!%p497_p10)
}
  0x1a   :  { %s501_s8 = scalar_lea.vmem %s591_s15, 128  ;;  %p506_p12 = scmp.lt.s32.totalorder %s591_s15, %s591_s15 }
  0x1b   :  { %p502_p11 = scmp.ne.s32.totalorder %s591_s15, %s501_s8  ;;  %p507_p13 = scmp.lt.s32.totalorder %s501_s8, %s501_s8 }
  0x1d   :  { %p508_p0 = por %p507_p13, %p506_p12 }
  0x1f   :  { %p509_p1 = pnand %p508_p0, %p502_p11 }
  0x21   :  { %512 = shalt.err (!%p509_p1)
}
  0x22   :  { %22 = dma.hbm_to_vmem [thread:$0]  %s674_s0, 128, %s591_s15, [#allocation3], %s565_s24, %s565_s24, %s566_s25  }
  0x23   :  { %s567_s10 = smov [#allocation7]   ;;  %s513_s14 = scalar_lea.hbm %s676_s2, 128 }
  0x24   :  { %s40_s11 = sshll.u32 %s567_s10, 4  ;;  %p514_p2 = scmp.ne.s32.totalorder %s676_s2, %s513_s14  ;;  %s41_s11 = int_to_ptr.vmem [resolvable:$true] %s40_s11 }
  0x25   :  { %p517_p3 = scmp.lt.u32.totalorder %s513_s14, %s676_s2 }
  0x27   :  { %p519_p4 = pnand %p517_p3, %p514_p2 }
  0x29   :  { %522 = shalt.err (!%p519_p4)
}
  0x2a   :  { %s523_s20 = scalar_lea.vmem %s41_s11, 128  ;;  %p528_p6 = scmp.lt.s32.totalorder %s41_s11, %s41_s11 }
  0x2b   :  { %p524_p5 = scmp.ne.s32.totalorder %s41_s11, %s523_s20  ;;  %p529_p7 = scmp.lt.s32.totalorder %s523_s20, %s523_s20 }
  0x2d   :  { %p530_p8 = por %p529_p7, %p528_p6 }
  0x2f   :  { %p531_p9 = pnand %p530_p8, %p524_p5 }
  0x31   :  { %534 = shalt.err (!%p531_p9)
}
  0x32   :  { %46 = dma.hbm_to_vmem [thread:$0]  %s676_s2, 128, %s41_s11, [#allocation6], %s565_s24, %s565_s24, %s566_s25  }
  0x33   :  { %557 = dma.done.wait [#allocation3], 128  }
  0x34   :  { %558 = vsyncadd [#allocation3], 4294967168 }
  0x35   :  { %559 = dma.done.wait [#allocation6], 256  }
  0x36   :  { %560 = vsyncadd [#allocation6], 4294967040  ;;  %v568_v0 = vmov 0.0   ;;  %vm569_vm0 = vmmov 0   ;;  %vm64_vm1 = vcmask 31744   ;;  %vm217_vm2 = vcmask 27648  }
  0x37   :  { %433 = vmatprep.subr.mxu0 %v568_v0  ;;  %435 = vmatprep.mubr.msk.f32.mxu0 %vm569_vm0, %v568_v0  ;;  %v56_v1 = vld [vmem:[#allocation2] sm:$0xf]  ;;  %v57_v2 = vld [vmem:[#allocation2 + $0x4] sm:$0xf]  ;;  %v58_v11 = vld [vmem:[#allocation5] sm:$0xf] }
  0x38   :  { %438 = vmatprep.subr.mxu1 %v568_v0  ;;  %440 = vmatprep.mubr.msk.f32.mxu1 %vm569_vm0, %v568_v0  ;;  %v62_v3 = vmul.f32 2.0343017e-05, %v56_v1  ;;  %v63_v4 = vmul.f32 2.0343017e-05, %v57_v2  ;;  %vm241_vm3 = vcmask 1043456   ;;  %s570_s2 = smov [#allocation8]  }
  0x39   :  { %434 = vmatpush3.xpose.msk.msra.mxu0 %vm64_vm1, %v56_v1  ;;  %439 = vmatpush3.xpose.msk.msra.mxu1 %vm64_vm1, %v57_v2  ;;  %v59_v12 = vld [vmem:[#allocation5 + $0x4] sm:$0xf]  ;;  %v60_v19 = vld [vmem:[#allocation7] sm:$0xf]  ;;  %v61_v23 = vld [vmem:[#allocation7 + $0x4] sm:$0xf] }
  0x3a   :  { %443 = vmatprep.subr.mxu0 %v568_v0  ;;  %448 = vmatprep.subr.mxu1 %v568_v0  ;;  %s404_s21 = sshll.u32 %s570_s2, 4  ;;  %s405_s21 = int_to_ptr.vmem [resolvable:$true] %s404_s21 }
  0x3b   :  { %s535_s22 = scalar_lea.vmem %s405_s21, 128  ;;  %p540_p11 = scmp.lt.s32.totalorder %s405_s21, %s405_s21 }
  0x3c   :  { %436 = vmatmul.mubr.msk.f32.vlgmr.msra.gmra.mrb[0].mxu0 %vm64_vm1, %v62_v3  ;;  %441 = vmatmul.mubr.msk.f32.vlgmr.msra.gmra.mrb[0].mxu1 %vm64_vm1, %v63_v4  ;;  %p536_p10 = scmp.ne.s32.totalorder %s405_s21, %s535_s22  ;;  %p541_p12 = scmp.lt.s32.totalorder %s535_s22, %s535_s22 }
  0x3d   :  { %445 = vmatprep.mubr.msk.f32.mxu0 %vm569_vm0, %v568_v0  ;;  %450 = vmatprep.mubr.msk.f32.mxu1 %vm569_vm0, %v568_v0 }
  0x3e   :  { %444 = vmatpush3.msk.msra.mxu0 %vm241_vm3, %v58_v11  ;;  %449 = vmatpush3.msk.msra.mxu1 %vm241_vm3, %v59_v12  ;;  %p542_p13 = por %p541_p12, %p540_p11 }
  0x40   :  { %p543_p0 = pnand %p542_p13, %p536_p10 }
 0x10f   :  { %v137_v5 = vpop.f32.mrb[0].mxu0  ;;  %v213_v6 = vpop.f32.mrb[0].mxu1 }
 0x110   :  { %v437_v7 = vpop.f32.mrb[1].mxu0  ;;  %v218_v8 = vsel %vm217_vm2, %v137_v5, -inf  ;;  %v442_v9 = vpop.f32.mrb[1].mxu1  ;;  %v221_v10 = vsel %vm217_vm2, %v213_v6, -inf }
 0x111   :  { %219 = vmax.xlane.f32.xlu0 %v218_v8 }
 0x115   :  { %222 = vmax.xlane.f32.xlu0 %v221_v10 }
 0x19e   :  { %v220_v13 = vpop.xlane.xlu0 %219 }
 0x19f   :  { %v224_v14 = vsub.f32 %v137_v5, %v220_v13 }
 0x1a1   :  { %v226_v15 = vmul.f32 1.442695, %v224_v14 }
 0x1a2   :  { %v223_v16 = vpop.xlane.xlu0 %222 }
 0x1a3   :  { %461 = vpow2.f32 %v226_v15  ;;  %v225_v17 = vsub.f32 %v213_v6, %v223_v16 }
 0x1a5   :  { %v228_v18 = vmul.f32 1.442695, %v225_v17 }
 0x1a7   :  { %463 = vpow2.f32 %v228_v18 }
 0x1ad   :  { %v462_v20 = vpop.eup %461 }
 0x1ae   :  { %v230_v21 = vsel %vm217_vm2, %v462_v20, 0.0  ;;  %v236_v22 = vmul.f32 %v462_v20, %v60_v19 }
 0x1af   :  { %231 = vadd.xlane.f32.xlu1 %v230_v21 }
 0x1b0   :  { %446 = vmatmul.mubr.msk.f32.vlgmr.msra.gmra.mrb[2].mxu0 %vm64_vm1, %v236_v22 }
 0x1b1   :  { %v464_v24 = vpop.eup %463 }
 0x1b2   :  { %v233_v25 = vsel %vm217_vm2, %v464_v24, 0.0  ;;  %v237_v26 = vmul.f32 %v464_v24, %v61_v23 }
 0x1b3   :  { %234 = vadd.xlane.f32.xlu1 %v233_v25 }
 0x1b4   :  { %451 = vmatmul.mubr.msk.f32.vlgmr.msra.gmra.mrb[2].mxu1 %vm64_vm1, %v237_v26 }
 0x23c   :  { %v232_v27 = vpop.xlane.xlu1 %231 }
 0x23d   :  { %465 = vrcp.f32 %v232_v27 }
 0x240   :  { %v235_v28 = vpop.xlane.xlu1 %234 }
 0x241   :  { %467 = vrcp.f32 %v235_v28 }
 0x247   :  { %v466_v29 = vpop.eup %465 }
 0x24b   :  { %v468_v33 = vpop.eup %467 }
 0x283   :  { %v311_v30 = vpop.f32.mrb[2].mxu0 }
 0x284   :  { %v395_v31 = vmul.f32 %v466_v29, %v311_v30  ;;  %v447_v32 = vpop.f32.mrb[3].mxu0 }
 0x286   :  { %397 = vst.msk [vmem:[#allocation8] sm:$0xf] %vm217_vm2, %v395_v31 }
 0x287   :  { %v387_v34 = vpop.f32.mrb[2].mxu1 }
 0x288   :  { %v396_v35 = vmul.f32 %v468_v33, %v387_v34  ;;  %v452_v36 = vpop.f32.mrb[3].mxu1 }
 0x28a   :  { %398 = vst.msk [vmem:[#allocation8 + $0x4] sm:$0xf] %vm217_vm2, %v396_v35 }
 0x28b   :  { %546 = shalt.err (!%p543_p0)
}
 0x28c   :  { %s547_s27 = scalar_lea.hbm %s677_s3, 128 }
 0x28d   :  { %p548_p1 = scmp.ne.s32.totalorder %s677_s3, %s547_s27  ;;  %p551_p2 = scmp.lt.u32.totalorder %s547_s27, %s677_s3 }
 0x28f   :  { %p553_p3 = pnand %p551_p2, %p548_p1 }
 0x291   :  { %556 = shalt.err (!%p553_p3)
}
 0x292   :  { %410 = dma.vmem_to_hbm [thread:$0]  %s405_s21, 128, %s677_s3, [#allocation4], %s565_s24, %s565_s24, %s566_s25  }
 0x293   :  { %561 = dma.done.wait [#allocation4], 128  }
 0x294   :  { %562 = vsyncadd [#allocation4], 4294967168 }
 0x295   :  { %414 = vsyncpa [#allocation3], 1 }
 0x296   :  { %415 = vsyncpa [#allocation6], 1 }
 0x297   :  { %416 = vsyncpa [#allocation4], 1 }

</bundles_post_ra>
